<compile_context>
chip_gen: v5e
topology: v5e:2x2
jax: 0.10.0
libtpu: 0.0.40
codegen_flags: <defaults>
</compile_context>

<pallas_src>
import functools
import math

import jax
import jax.numpy as jnp
import numpy as np
from jax.experimental import pallas as pl
from jax.experimental.pallas import tpu as pltpu


def _round_up(x, m):
    return ((x + m - 1) // m) * m


# ------------------------------ Pallas kernel -------------------------------

def _fp_cnn_kernel(flag_ref, x_ref, w_ref, b_ref, o_ref, h_ref, *,
                   concat_hidden, has_residual):
    """One (batch-tile, layer) grid step of the fused conv(len-1)+relu stack.

    flag_ref: (L,) int32 SMEM   -- 1 if layer l has a residual connection
    x_ref   : (TM, Dpad) f32    -- padded input features (same block for all l)
    w_ref   : (Dpad, Dpad) bf16 -- layer l effective (center-tap) weights
    b_ref   : (1, Dpad)  f32    -- layer l bias
    o_ref   : (TM, Dpad) f32    -- output block (last layer, or layer slot if concat)
    h_ref   : (TM, Dpad) f32    -- VMEM scratch: running activation across layers
    """
    l = pl.program_id(1)
    n_layers = pl.num_programs(1)

    @pl.when(l == 0)
    def _():
        h_ref[...] = x_ref[...]

    h = h_ref[...]
    # bf16 operands on the MXU, f32 accumulation.
    y = jnp.dot(h.astype(jnp.bfloat16), w_ref[...],
                preferred_element_type=jnp.float32)
    y = y + b_ref[...]
    y = jnp.maximum(y, 0.0)
    if has_residual:
        res_scale = (flag_ref[l] != 0).astype(jnp.float32)
        y = y + res_scale * h
    h_ref[...] = y

    if concat_hidden:
        o_ref[...] = y
    else:
        @pl.when(l == n_layers - 1)
        def _():
            o_ref[...] = y


# ------------------------------ jitted wrapper -------------------------------

@functools.partial(jax.jit,
                   static_argnames=("concat_hidden", "has_residual", "real_dims"))
def _fp_cnn_forward(graph_feature, w_stack, b_stack, res_flags, *,
                    concat_hidden, has_residual, real_dims):
    B, in_dim = graph_feature.shape
    L, dpad, _ = w_stack.shape

    # Batch tile: multiple of 8 sublanes, capped at 256 (fills MXU M on v6e/v7x).
    tm = min(256, _round_up(max(B, 1), 8))
    b_pad = _round_up(B, tm)

    # Single cheap pad: rows up to a TM multiple, features up to the lane width.
    x = graph_feature.astype(jnp.float32)
    x = jnp.pad(x, ((0, b_pad - B), (0, dpad - in_dim)))

    out_width = L * dpad if concat_hidden else dpad

    if concat_hidden:
        out_spec = pl.BlockSpec((tm, dpad), lambda b, l, *_: (b, l))
    else:
        out_spec = pl.BlockSpec((tm, dpad), lambda b, l, *_: (b, 0))

    grid_spec = pltpu.PrefetchScalarGridSpec(
        num_scalar_prefetch=1,                 # residual flags -> SMEM
        grid=(b_pad // tm, L),
        in_specs=[
            pl.BlockSpec((tm, dpad), lambda b, l, *_: (b, 0)),             # x
            pl.BlockSpec((None, dpad, dpad), lambda b, l, *_: (l, 0, 0)),  # W_l
            pl.BlockSpec((None, 1, dpad), lambda b, l, *_: (l, 0, 0)),     # b_l
        ],
        out_specs=out_spec,
        scratch_shapes=[pltpu.VMEM((tm, dpad), jnp.float32)],              # activation carry
    )

    kernel = functools.partial(_fp_cnn_kernel,
                               concat_hidden=concat_hidden,
                               has_residual=has_residual)

    cost = pl.CostEstimate(
        flops=2 * L * b_pad * dpad * dpad,
        transcendentals=0,
        bytes_accessed=(w_stack.size * w_stack.dtype.itemsize
                        + b_stack.size * b_stack.dtype.itemsize
                        + x.size * 4 + b_pad * out_width * 4),
    )

    out = pl.pallas_call(
        kernel,
        out_shape=jax.ShapeDtypeStruct((b_pad, out_width), jnp.float32),
        grid_spec=grid_spec,
        compiler_params=pltpu.CompilerParams(
            dimension_semantics=("parallel", "arbitrary")),
        cost_estimate=cost,
    )(res_flags, x, w_stack, b_stack)

    out = out[:B]
    if concat_hidden:
        # Single gather of the real (unpadded) columns of every layer slot.
        cols = np.concatenate(
            [l * dpad + np.arange(real_dims[l + 1]) for l in range(L)]
        ).astype(np.int32)
        return jnp.take(out, jnp.asarray(cols), axis=1)
    return out[:, :real_dims[-1]]


# -------------------------------- Module port --------------------------------

class FPConvolutionalNetworkPallas:
    """JAX/Pallas port of torchdrug FPConvolutionalNetwork (forward only)."""

    def __init__(self, input_dim, hidden_dims, kernel_size=3, stride=1,
                 padding=1, activation="relu", short_cut=False,
                 concat_hidden=False, key=None):
        if not isinstance(hidden_dims, (list, tuple)):
            hidden_dims = [hidden_dims]
        # TODO(synk): only relu is implemented in-kernel (module default).
        assert activation == "relu", "only relu is implemented in-kernel"
        if key is None:
            key = jax.random.PRNGKey(0)

        self.input_dim = input_dim
        self.output_dim = sum(hidden_dims) if concat_hidden else hidden_dims[-1]
        self.dims = [input_dim] + list(hidden_dims)
        self.kernel_size = kernel_size
        self.stride = stride
        self.padding = padding
        self.short_cut = short_cut
        self.concat_hidden = concat_hidden

        # Conv output length over the length-1 sequence must be 1 (module default
        # K=3, stride=1, pad=1 satisfies this); the single-tap simplification also
        # requires padding < kernel_size.
        l_out = (1 + 2 * padding - kernel_size) // stride + 1
        assert l_out == 1, "this port assumes the conv output length is 1"
        assert padding < kernel_size

        n_layers = len(self.dims) - 1
        # Lane-dense padded width (multiple of 128) shared by every layer so the
        # activation carry / stacked weight tiles have one static shape.
        self.dpad = max(128, _round_up(max(self.dims), 128))

        # Parameter init matching PyTorch Conv1d default: U(-sqrt(k), sqrt(k)),
        # k = 1 / (C_in * kernel_size).
        self.weights = []          # raw (Dout, Din, K) f32 -- kept for reference()
        self.biases = []           # raw (Dout,) f32
        w_eff_list, b_pad_list = [], []
        for i in range(n_layers):
            din, dout = self.dims[i], self.dims[i + 1]
            key, kw, kb = jax.random.split(key, 3)
            bound = 1.0 / math.sqrt(din * kernel_size)
            w = jax.random.uniform(kw, (dout, din, kernel_size),
                                   jnp.float32, -bound, bound)
            b = jax.random.uniform(kb, (dout,), jnp.float32, -bound, bound)
            self.weights.append(w)
            self.biases.append(b)
            # Effective (center-tap) weight, transposed and zero-padded once.
            w_eff = jnp.zeros((self.dpad, self.dpad), jnp.float32)
            w_eff = w_eff.at[:din, :dout].set(w[:, :, padding].T)
            b_pad = jnp.zeros((1, self.dpad), jnp.float32)
            b_pad = b_pad.at[0, :dout].set(b)
            w_eff_list.append(w_eff)
            b_pad_list.append(b_pad)

        # bf16 weight slab (halved HBM->VMEM bytes, native MXU path); f32 biases.
        self.w_stack = jnp.stack(w_eff_list).astype(jnp.bfloat16)  # (L, Dpad, Dpad)
        self.b_stack = jnp.stack(b_pad_list)                       # (L, 1, Dpad)
        # Residual only when real dims match (shape check in the PyTorch module).
        self.residual_flags = tuple(
            bool(short_cut and self.dims[i] == self.dims[i + 1])
            for i in range(n_layers))
        self.res_flags = jnp.asarray(
            [1 if f else 0 for f in self.residual_flags], dtype=jnp.int32)
        self.has_residual = any(self.residual_flags)

    def __call__(self, graph_feature):
        # graph_feature: (B, input_dim) == graph.graph_feature
        return _fp_cnn_forward(
            graph_feature, self.w_stack, self.b_stack, self.res_flags,
            concat_hidden=self.concat_hidden,
            has_residual=self.has_residual,
            real_dims=tuple(self.dims))

    # Pure-JAX f32 reference (numerical validation of the kernel path).
    def reference(self, graph_feature):
        layer_input = graph_feature.astype(jnp.float32)
        hiddens = []
        for w, b in zip(self.weights, self.biases):
            # Only tap `padding` of the conv kernel sees real data (length-1 seq).
            y = layer_input @ w[:, :, self.padding].T + b
            h = jnp.maximum(y, 0.0)
            if self.short_cut and h.shape == layer_input.shape:
                h = h + layer_input
            hiddens.append(h)
            layer_input = h
        return jnp.concatenate(hiddens, -1) if self.concat_hidden else hiddens[-1]


# ----------------------------------- Main ------------------------------------

if __name__ == "__main__":
    key = jax.random.PRNGKey(0)
    k_feat, k_params = jax.random.split(key)

    batch = 4
    input_dim = 21                 # "drug is 21 for now"
    hidden_dims = [32, 32]

    # Synthetic fingerprint / graph feature: graph.graph_feature
    graph_feature = jax.random.normal(k_feat, (batch, input_dim), jnp.float32)

    # Default config: no short-cut, no concat.
    model = FPConvolutionalNetworkPallas(
        input_dim=input_dim, hidden_dims=hidden_dims,
        kernel_size=3, stride=1, padding=1,
        activation="relu", short_cut=False, concat_hidden=False,
        key=k_params)
    out = jax.block_until_ready(model(graph_feature))
    assert out.shape == (batch, hidden_dims[-1]), out.shape
    ref = model.reference(graph_feature)
    # bf16 matmul operands (f32 accumulation) -> relaxed tolerance vs f32 ref.
    assert jnp.allclose(out, ref, atol=5e-2, rtol=5e-2), \
        float(jnp.max(jnp.abs(out - ref)))

    # Also exercise the short_cut + concat_hidden code path in the fused kernel.
    model2 = FPConvolutionalNetworkPallas(
        input_dim=input_dim, hidden_dims=[32, 32, 32],
        short_cut=True, concat_hidden=True, key=k_params)
    out2 = jax.block_until_ready(model2(graph_feature))
    assert out2.shape == (batch, 96), out2.shape
    ref2 = model2.reference(graph_feature)
    assert jnp.allclose(out2, ref2, atol=5e-2, rtol=5e-2), \
        float(jnp.max(jnp.abs(out2 - ref2)))

    print("KERNEL_OK")
</pallas_src>

<mosaic_0001>
module attributes {stable_mosaic.version = 11 : i64} {
  func.func @_fp_cnn_kernel(%arg0: i32, %arg1: i32, %arg2: memref<2xi32, #tpu.memory_space<smem>>, %arg3: memref<8x128xf32, #tpu.memory_space<vmem>>, %arg4: memref<1x128x128xbf16, #tpu.memory_space<vmem>>, %arg5: memref<1x1x128xf32, #tpu.memory_space<vmem>>, %arg6: memref<8x128xf32, #tpu.memory_space<vmem>>, %arg7: memref<8x128xf32, #tpu.memory_space<vmem>>) attributes {dimension_semantics = [#tpu.dimension_semantics<parallel>, #tpu.dimension_semantics<arbitrary>], iteration_bounds = array<i64: 1, 2>, scalar_prefetch = 1 : i64, scratch_operands = 1 : i64, tpu.core_type = #tpu.core_type<tc>, window_params = [{transform_indices = @transform_0, window_bounds = array<i64: 8, 128>}, {transform_indices = @transform_1, window_bounds = array<i64: 1, 128, 128>}, {transform_indices = @transform_2, window_bounds = array<i64: 1, 1, 128>}, {transform_indices = @transform_3, window_bounds = array<i64: 8, 128>}]} {
    %c0_i32 = arith.constant 0 : i32
    %0 = arith.cmpi eq, %arg1, %c0_i32 : i32
    %1 = arith.extui %0 : i1 to i32
    %c0_i32_0 = arith.constant 0 : i32
    %2 = arith.cmpi ne, %1, %c0_i32_0 : i32
    scf.if %2 {
      %c0_12 = arith.constant 0 : index
      %c0_13 = arith.constant 0 : index
      %18 = vector.load %arg3[%c0_12, %c0_13] : memref<8x128xf32, #tpu.memory_space<vmem>>, vector<8x128xf32>
      %c0_14 = arith.constant 0 : index
      %c0_15 = arith.constant 0 : index
      %19 = vector.load %arg7[%c0_14, %c0_15] : memref<8x128xf32, #tpu.memory_space<vmem>>, vector<8x128xf32>
      tpu.vector_store %arg7[%c0_14, %c0_15], %18 {strides = array<i32>} : memref<8x128xf32, #tpu.memory_space<vmem>>, vector<8x128xf32>,
    } else {
    }
    %c0 = arith.constant 0 : index
    %c0_1 = arith.constant 0 : index
    %3 = vector.load %arg7[%c0, %c0_1] : memref<8x128xf32, #tpu.memory_space<vmem>>, vector<8x128xf32>
    %4 = arith.truncf %3 : vector<8x128xf32> to vector<8x128xbf16>
    %c0_2 = arith.constant 0 : index
    %c0_3 = arith.constant 0 : index
    %c0_4 = arith.constant 0 : index
    %5 = vector.load %arg4[%c0_2, %c0_3, %c0_4] : memref<1x128x128xbf16, #tpu.memory_space<vmem>>, vector<1x128x128xbf16>
    %6 = vector.shape_cast %5 : vector<1x128x128xbf16> to vector<128x128xbf16>
    %cst = arith.constant dense<0.000000e+00> : vector<8x128xf32>
    %7 = tpu.matmul %4, %6, %cst {dimension_numbers = #tpu.dot_dimension_numbers<[1], [0], [0], [1], [0, 0, 1, 1], [], []>} : vector<8x128xbf16>, vector<128x128xbf16>, vector<8x128xf32> -> vector<8x128xf32>
    %c0_5 = arith.constant 0 : index
    %c0_6 = arith.constant 0 : index
    %c0_7 = arith.constant 0 : index
    %8 = vector.load %arg5[%c0_5, %c0_6, %c0_7] : memref<1x1x128xf32, #tpu.memory_space<vmem>>, vector<1x1x128xf32>
    %9 = vector.shape_cast %8 : vector<1x1x128xf32> to vector<1x128xf32>
    %10 = vector.broadcast %9 : vector<1x128xf32> to vector<8x128xf32>
    %11 = arith.addf %7, %10 : vector<8x128xf32>
    %cst_8 = arith.constant 0.000000e+00 : f32
    %12 = vector.broadcast %cst_8 : f32 to vector<8x128xf32>
    %13 = arith.maximumf %11, %12 : vector<8x128xf32>
    %c0_9 = arith.constant 0 : index
    %c0_10 = arith.constant 0 : index
    %14 = vector.load %arg7[%c0_9, %c0_10] : memref<8x128xf32, #tpu.memory_space<vmem>>, vector<8x128xf32>
    tpu.vector_store %arg7[%c0_9, %c0_10], %13 {strides = array<i32>} : memref<8x128xf32, #tpu.memory_space<vmem>>, vector<8x128xf32>,
    %c1_i32 = arith.constant 1 : i32
    %15 = arith.cmpi eq, %arg1, %c1_i32 : i32
    %16 = arith.extui %15 : i1 to i32
    %c0_i32_11 = arith.constant 0 : i32
    %17 = arith.cmpi ne, %16, %c0_i32_11 : i32
    scf.if %17 {
      %c0_12 = arith.constant 0 : index
      %c0_13 = arith.constant 0 : index
      %18 = vector.load %arg6[%c0_12, %c0_13] : memref<8x128xf32, #tpu.memory_space<vmem>>, vector<8x128xf32>
      tpu.vector_store %arg6[%c0_12, %c0_13], %13 {strides = array<i32>} : memref<8x128xf32, #tpu.memory_space<vmem>>, vector<8x128xf32>,
    } else {
    }
    return
  }
  func.func @transform_0(%arg0: i32, %arg1: i32, %arg2: memref<2xi32, #tpu.memory_space<smem>>) -> (i32, i32) {
    %c0_i32 = arith.constant 0 : i32
    %c0_i32_0 = arith.constant 0 : i32
    return %arg0, %c0_i32 : i32, i32
  }
  func.func @transform_1(%arg0: i32, %arg1: i32, %arg2: memref<2xi32, #tpu.memory_space<smem>>) -> (i32, i32, i32) {
    %c0_i32 = arith.constant 0 : i32
    %c0_i32_0 = arith.constant 0 : i32
    %c0_i32_1 = arith.constant 0 : i32
    return %arg1, %c0_i32, %c0_i32_0 : i32, i32, i32
  }
  func.func @transform_2(%arg0: i32, %arg1: i32, %arg2: memref<2xi32, #tpu.memory_space<smem>>) -> (i32, i32, i32) {
    %c0_i32 = arith.constant 0 : i32
    %c0_i32_0 = arith.constant 0 : i32
    %c0_i32_1 = arith.constant 0 : i32
    return %arg1, %c0_i32, %c0_i32_0 : i32, i32, i32
  }
  func.func @transform_3(%arg0: i32, %arg1: i32, %arg2: memref<2xi32, #tpu.memory_space<smem>>) -> (i32, i32) {
    %c0_i32 = arith.constant 0 : i32
    %c0_i32_0 = arith.constant 0 : i32
    return %arg0, %c0_i32 : i32, i32
  }
}

</mosaic_0001>

<bundles_post_ra>
// kernel: _fp_cnn_forward.1
= control target key start
LH: loop header
LB: loop body
LE: loop exit
PB: predicated region body
PF: predicated region fallthrough
CT: control target
= control target key end

     0   :  { %s643_s18 = smov [#allocation4]   ;;  %s770_s0 = inlined_call_operand.vmem [shape: s32[2], index: 0, kind: input, shape index: {}]   ;;  %s771_s1 = inlined_call_operand.vmem [shape: f32[8,128], index: 1, kind: input, shape index: {}]   ;;  %s772_s2 = inlined_call_operand.hbm [shape: bf16[2,128,128], index: 2, kind: input, shape index: {}]   ;;  %s773_s3 = inlined_call_operand.vmem [shape: f32[2,1,128], index: 3, kind: input, shape index: {}]   ;;  %s774_s4 = inlined_call_operand.vmem [shape: f32[8,128], index: 4, kind: output, shape index: {}]  }
   0x1   :  { %s10_s17 = sshll.u32 %s770_s0, 4  ;;  %s11_s17 = int_to_ptr.vmem [resolvable:$true] %s10_s17 }
   0x2   :  { %13 = dma.vmem_to_smem %s11_s17, 16, %s643_s18, [#allocation3] }
   0x3   :  { %613 = dma.done.wait [#allocation3], 16 }
   0x4   :  { %614 = vsyncadd [#allocation3], 4294967280 }
   0x5   :  { %16 = sfence }
   0x6   :  { %17 = vsyncpa [#allocation6], 0 }
   0x7   :  { %19 = vsyncpa [#allocation6 + $0x1], 0  ;;  %s674_s19 = smov 0   ;;  %s676_s20 = smov 0  }
   0x8   :  { %s678_s21 = smov 0   ;;  %s680_s22 = smov 0  }
   0x9   :  { %s682_s23 = smov 0   ;;  %s684_s24 = smov 0  }
   0xa LB: > { %s433_s0 = sadd.s32 4294967295, %s641_s24   ;;  %s34_s25 = sadd.s32 1, %s637_s23  ;;  %s641_s24 = sphi %s684_s24, %s25_s24   ;;  %s637_s23 = sphi %s682_s23, %s781_s23   ;;  %s633_s22 = sphi %s680_s22, %s780_s22   ;;  %s629_s21 = sphi %s678_s21, %s779_s21   ;;  %s625_s20 = sphi %s676_s20, %s778_s20   ;;  %s621_s19 = sphi %s674_s19, %s777_s19  }
   0xb   : > { %p35_p0 = scmp.ge.s32.totalorder %s34_s25, 2  ;;  %s70_s26 = sadd.s32 1, %s629_s21 }
   0xc   : > { %p77_p1 = scmp.ne.s32.totalorder %s629_s21, %s625_s20  ;;  %p78_p2 = scmp.eq.s32.totalorder %s641_s24, 0 }
   0xd   : > { %s783_s25 = smov (%p35_p0, %s34_s25), 0  ;;  %p83_p4 = scmp.ne.s32.totalorder %s625_s20, %s621_s19 }
   0xe   : > { %p710_p3 = por %p78_p2, %p77_p1  ;;  %s67_s28 = ssub.s32 %s637_s23, %s783_s25 }
   0xf   : > { %p84_p5 = scmp.eq.s32.totalorder %s433_s0, 0  ;;  %p68_p6 = scmp.eq.s32.totalorder %s67_s28, 0 }
  0x10   : > { %p494_p8 = scmp.lt.s32.totalorder %s641_s24, 2  ;;  %s166_s5 = sand.u32 1, %s629_s21  }
  0x11   : > { %p717_p7 = por %p84_p5, %p83_p4  ;;  %s479_s6 = sshll.u32 %s637_s23, 6 }
  0x12   : > { %s723_s30 = scalar_select %p68_p6, %s629_s21, %s70_s26  }
  0x13   : > { %s437_s7 = sshll.u32 %s166_s5, 6  ;;  %s175_s10 = scalar_lea.hbm %s772_s2, %s479_s6 }
  0x14   : > { %s176_s11 = sshll.u32 %s175_s10, 4  ;;  %s170_s12 = scalar_lea.vmem [#allocation5], %s437_s7  ;;  %s177_s11 = int_to_ptr.hbm [resolvable:$true] %s176_s11 }
  0x15   : > { %s178_s13 = sshll.u32 %s170_s12, 4  ;;  %p491_p9 = pnand %p494_p8, %p710_p3  ;;  %s179_s13 = int_to_ptr.vmem [resolvable:$true] %s178_s13 }
  0x16   : > { %p440_p10 = scmp.ge.s32.totalorder %s641_s24, 1  ;;  %p192_p11 = scmp.lt.s32.totalorder %s641_s24, 3 }
  0x17   : > { %s167_s14 = scalar_lea.sflag [#allocation6], %s166_s5  ;;  %s644_s15 = smov 64  }
  0x18   : > { %s645_s16 = smov 4   ;;  %p193_p12 = pnand %p440_p10, %p192_p11 }
  0x19   : > { %493 = dma.hbm_to_vmem [thread:$0]  (!%p491_p9), %s177_s11, 1024, %s179_s13, %s167_s14, %s644_s15, %s644_s15, %s645_s16  }
  0x1a   : > { %196 = sbr.rel (%p193_p12) target bundleno = 209 (0xd1), region = 32  ;;  %s198_s17 = sand.u32 (!%p193_p12), 1, %s625_s20  }
  0x1b   : > { %s441_s18 = sshll.u32 (!%p193_p12), %s198_s17, 6  ;;  %s199_s19 = scalar_lea.sflag (!%p193_p12), [#allocation6], %s198_s17 }
  0x1c   : > { %s202_s0 = scalar_lea.vmem (!%p193_p12), [#allocation5], %s441_s18 }
  0x1f   : > { %616 = dma.done.wait (%p717_p7), %s199_s19, 1024  }
  0x20   : > { %618 = vsyncadd (%p717_p7), %s199_s19, 4294966272  ;;  %p236_p13 = scmp.lt.s32.totalorder %s633_s22, 1  ;;  %p442_p0 = scmp.ne.s32.totalorder %s633_s22, 0 }
  0x22   : > { %s237_s26 = scalar_select %p236_p13, %s633_s22, 1 }
  0x23   : > { %246 = sbr.rel (%p442_p0) target bundleno = 42 (0x2a), region = 40 }
  0x24   : > { %s238_s5 = scalar_lea.vmem %s773_s3, %s237_s26 }
  0x28   : > { %v247_v0 = vld [vmem:[%s771_s1] sm:$0xff] }
  0x29   : > { %248 = vst [vmem:[#allocation2] sm:$0xff] %v247_v0 }
  0x2a PF: > { %v487_v1 = vld [vmem:[%s202_s0 + $0x38] sm:$0xff]  ;;  %v486_v2 = vld [vmem:[%s202_s0 + $0x30] sm:$0xff]  ;;  %v485_v3 = vld [vmem:[%s202_s0 + $0x28] sm:$0xff]  ;;  %p475_p1 = scmp.ne.s32.totalorder %s633_s22, 1 }
  0x2b   : > { %319 = vmatpush.bf16.msra.mxu0 %v487_v1  ;;  %v484_v4 = vld [vmem:[%s202_s0 + $0x20] sm:$0xff]  ;;  %v483_v5 = vld [vmem:[%s202_s0 + $0x18] sm:$0xff]  ;;  %v482_v6 = vld [vmem:[%s202_s0 + $0x10] sm:$0xff] }
  0x2c   : > { %v481_v7 = vld [vmem:[%s202_s0 + $0x8] sm:$0xff]  ;;  %v480_v8 = vld [vmem:[%s202_s0] sm:$0xff]  ;;  %v546_v11 = vld [vmem:[%s238_s5] ss:$0 sm:$0xff] }
  0x2f   : > { %320 = vmatpush.bf16.msra.mxu0 %v486_v2 }
  0x30   : > { %v249_v9 = vld [vmem:[#allocation2] sm:$0xff] }
  0x31   : > { %v250_v10 = vpack.c.bf16 %v249_v9, %v249_v9 }
  0x33   : > { %321 = vmatpush.bf16.msra.mxu0 %v485_v3 }
  0x37   : > { %322 = vmatpush.bf16.msra.mxu0 %v484_v4 }
  0x3b   : > { %323 = vmatpush.bf16.msra.mxu0 %v483_v5 }
  0x3f   : > { %324 = vmatpush.bf16.msra.mxu0 %v482_v6 }
  0x43   : > { %325 = vmatpush.bf16.msra.mxu0 %v481_v7 }
  0x47   : > { %326 = vmatpush.bf16.msra.mxu0 %v480_v8 }
  0x4a   : > { %327 = vmatmul.bf16.vlgmr.msra.gmra.mxu0 %v250_v10 }
  0xc7   : > { %v328_v12 = vpop.f32.mrf.mxu0 }
  0xc8   : > { %v329_v13 = vadd.f32 %v546_v11, %v328_v12 }
  0xca   : > { %v332_v14 = vmax.f32 %v329_v13, 0.0 }
  0xcb   : > { %337 = sbr.rel (%p475_p1) target bundleno = 209 (0xd1), region = 44 }
  0xcc   : > { %333 = vst [vmem:[#allocation2] sm:$0xff] %v332_v14 }
  0xcf   : > { %v330_v15 = vpop.f32.mrf.mxu0 }
  0xd0   : > { %338 = vst [vmem:[%s774_s4] sm:$0xff] %v332_v14 }
  0xd1 PF: > { %s25_s24 = sadd.s32 1, %s641_s24   ;;  %s777_s19 = smov %s625_s20 }
  0xd2   : > { %p22_p2 = scmp.ge.s32.totalorder %s25_s24, 4   ;;  %s778_s20 = smov %s629_s21 }
  0xd3   : > { %s779_s21 = smov %s723_s30  ;;  %s780_s22 = smov %s637_s23 }
  0xd4   : > { %s781_s23 = smov %s783_s25  ;;  %24 = sbr.rel (!%p22_p2) target bundleno = 10 (0xa), region = 86 }
  0xd9   :  { %358 = vsyncpa [#allocation6], 1 }
  0xda   :  { %360 = vsyncpa [#allocation6 + $0x1], 1 }

</bundles_post_ra>
